<compile_context>
chip_gen: v7x
topology: tpu7x:2x2x1
jax: 0.10.0
libtpu: 0.0.40
codegen_flags: <defaults>
</compile_context>

<pallas_src>
import functools
import math

import jax
import jax.numpy as jnp
from jax.experimental import pallas as pl
from jax.experimental.pallas import tpu as pltpu

_LANE = 128
_BLOCK_B = 256  # batch tile used only when B is a large multiple of it


def _round_up(n, m):
    return ((n + m - 1) // m) * m


def _mlp_kernel(x_ref, w1_ref, w2_ref, b2_ref, o_ref):
    # fc1 (no bias): (Bt, Din) @ (Din, Hp) -> (Bt, Hp), straight MXU push, f32 accumulate.
    h = jnp.dot(x_ref[...], w1_ref[...], preferred_element_type=jnp.float32)
    h = jnp.maximum(h, 0.0)  # ReLU (VPU)
    # fc2: (Bt, Hp) @ (Hp, Cp) -> (Bt, Cp), then bias broadcast.
    out = jnp.dot(h, w2_ref[...], preferred_element_type=jnp.float32)
    o_ref[...] = (out + b2_ref[...]).astype(o_ref.dtype)


def prepare_params(w1, w2, b2):
    """One-time weight prep (NOT in the per-call path).

    Takes PyTorch Linear layouts — w1: (H, Din), w2: (C, H), b2: (C,) — and returns
    lane-dense (K, N) layouts: w1_p (Din, Hp), w2_p (Hp, Cp), b2_p (1, Cp), Hp/Cp
    padded up to 128 with zeros.
    """
    H, Din = w1.shape
    C = w2.shape[0]
    Hp = _round_up(H, _LANE)
    Cp = _round_up(C, _LANE)

    w1_p = jnp.zeros((Din, Hp), w1.dtype).at[:, :H].set(w1.T)
    w2_p = jnp.zeros((Hp, Cp), w2.dtype).at[:H, :C].set(w2.T)
    b2_p = jnp.zeros((1, Cp), b2.dtype).at[0, :C].set(b2)
    return w1_p, w2_p, b2_p


@functools.partial(jax.jit, static_argnames=("num_classes",))
def net_forward(x, w1_p, w2_p, b2_p, *, num_classes):
    """x: (B, Din); pre-padded params from prepare_params. Returns (B, num_classes)."""
    B, Din = x.shape
    Hp = w1_p.shape[1]
    Cp = w2_p.shape[1]

    if B > _BLOCK_B and B % _BLOCK_B == 0:
        # Scaling path: tile over the batch and let Mosaic shard rows across
        # TensorCores (v7x has 2 TCs). Weights are broadcast (same block every step).
        out_p = pl.pallas_call(
            _mlp_kernel,
            out_shape=jax.ShapeDtypeStruct((B, Cp), x.dtype),
            grid=(B // _BLOCK_B,),
            in_specs=[
                pl.BlockSpec((_BLOCK_B, Din), lambda i: (i, 0)),
                pl.BlockSpec((Din, Hp), lambda i: (0, 0)),
                pl.BlockSpec((Hp, Cp), lambda i: (0, 0)),
                pl.BlockSpec((1, Cp), lambda i: (0, 0)),
            ],
            out_specs=pl.BlockSpec((_BLOCK_B, Cp), lambda i: (i, 0)),
            compiler_params=pltpu.CompilerParams(
                dimension_semantics=("parallel",)),
        )(x, w1_p, w2_p, b2_p)
    else:
        # Tiny/odd batches: gridless, everything resident in VMEM, no pipeline overhead.
        out_p = pl.pallas_call(
            _mlp_kernel,
            out_shape=jax.ShapeDtypeStruct((B, Cp), x.dtype),
            in_specs=[pl.BlockSpec(memory_space=pltpu.MemorySpace.VMEM)] * 4,
            out_specs=pl.BlockSpec(memory_space=pltpu.MemorySpace.VMEM),
        )(x, w1_p, w2_p, b2_p)

    # Slice back to the module's (B, C) output. Consumers that can take the lane-dense
    # (B, Cp) result directly should use out_p and skip this.
    return out_p[:, :num_classes]


def _kaiming_uniform(key, shape):
    # PyTorch kaiming_uniform (a=0, fan_in mode): bound = sqrt(2) * sqrt(3 / fan_in)
    fan_in = shape[1]
    gain = math.sqrt(2.0)
    bound = gain * math.sqrt(3.0 / fan_in)
    return jax.random.uniform(key, shape, jnp.float32, minval=-bound, maxval=bound)


if __name__ == "__main__":
    batch = 8
    input_size = 32
    hidden_size = 32
    num_classes = 16

    key = jax.random.PRNGKey(0)
    kx, k1, k2, kb = jax.random.split(key, 4)

    x = jax.random.normal(kx, (batch, input_size), jnp.float32)
    w1 = _kaiming_uniform(k1, (hidden_size, input_size))      # fc1.weight (H, Din), no bias
    w2 = _kaiming_uniform(k2, (num_classes, hidden_size))     # fc2.weight (C, H)
    # fc2.bias keeps PyTorch's default Linear bias init: U(-1/sqrt(fan_in), 1/sqrt(fan_in))
    b_bound = 1.0 / math.sqrt(hidden_size)
    b2 = jax.random.uniform(kb, (num_classes,), jnp.float32, minval=-b_bound, maxval=b_bound)

    # One-time parameter prep (pad + transpose) — outside the per-call path.
    w1_p, w2_p, b2_p = jax.block_until_ready(prepare_params(w1, w2, b2))

    out = net_forward(x, w1_p, w2_p, b2_p, num_classes=num_classes)
    jax.block_until_ready(out)

    # Reference check in plain JAX (PyTorch semantics: y = x @ W.T + b).
    ref = jnp.maximum(x @ w1.T, 0.0) @ w2.T + b2
    assert out.shape == ref.shape, f"shape mismatch {out.shape} vs {ref.shape}"
    assert jnp.allclose(out, ref, atol=1e-5, rtol=1e-5), "mismatch vs reference"

    print("KERNEL_OK")
</pallas_src>

<mosaic_0001>
module attributes {stable_mosaic.version = 11 : i64} {
  func.func @_mlp_kernel(%arg0: memref<8x32xf32, #tpu.memory_space<vmem>>, %arg1: memref<32x128xf32, #tpu.memory_space<vmem>>, %arg2: memref<128x128xf32, #tpu.memory_space<vmem>>, %arg3: memref<1x128xf32, #tpu.memory_space<vmem>>, %arg4: memref<8x128xf32, #tpu.memory_space<vmem>>) attributes {dimension_semantics = [], scalar_prefetch = 0 : i64, scratch_operands = 0 : i64, tpu.core_type = #tpu.core_type<tc>} {
    %c0 = arith.constant 0 : index
    %c0_0 = arith.constant 0 : index
    %0 = vector.load %arg0[%c0, %c0_0] : memref<8x32xf32, #tpu.memory_space<vmem>>, vector<8x32xf32>
    %c0_1 = arith.constant 0 : index
    %c0_2 = arith.constant 0 : index
    %1 = vector.load %arg1[%c0_1, %c0_2] : memref<32x128xf32, #tpu.memory_space<vmem>>, vector<32x128xf32>
    %cst = arith.constant dense<0.000000e+00> : vector<8x128xf32>
    %2 = tpu.matmul %0, %1, %cst {dimension_numbers = #tpu.dot_dimension_numbers<[1], [0], [0], [1], [0, 0, 1, 1], [], []>} : vector<8x32xf32>, vector<32x128xf32>, vector<8x128xf32> -> vector<8x128xf32>
    %cst_3 = arith.constant 0.000000e+00 : f32
    %3 = vector.broadcast %cst_3 : f32 to vector<8x128xf32>
    %4 = arith.maximumf %2, %3 : vector<8x128xf32>
    %c0_4 = arith.constant 0 : index
    %c0_5 = arith.constant 0 : index
    %5 = vector.load %arg2[%c0_4, %c0_5] : memref<128x128xf32, #tpu.memory_space<vmem>>, vector<128x128xf32>
    %cst_6 = arith.constant dense<0.000000e+00> : vector<8x128xf32>
    %6 = tpu.matmul %4, %5, %cst_6 {dimension_numbers = #tpu.dot_dimension_numbers<[1], [0], [0], [1], [0, 0, 1, 1], [], []>} : vector<8x128xf32>, vector<128x128xf32>, vector<8x128xf32> -> vector<8x128xf32>
    %c0_7 = arith.constant 0 : index
    %c0_8 = arith.constant 0 : index
    %7 = vector.load %arg3[%c0_7, %c0_8] : memref<1x128xf32, #tpu.memory_space<vmem>>, vector<1x128xf32>
    %8 = vector.broadcast %7 : vector<1x128xf32> to vector<8x128xf32>
    %9 = arith.addf %6, %8 : vector<8x128xf32>
    %c0_9 = arith.constant 0 : index
    %c0_10 = arith.constant 0 : index
    %10 = vector.load %arg4[%c0_9, %c0_10] : memref<8x128xf32, #tpu.memory_space<vmem>>, vector<8x128xf32>
    tpu.vector_store %arg4[%c0_9, %c0_10], %9 {strides = array<i32>} : memref<8x128xf32, #tpu.memory_space<vmem>>, vector<8x128xf32>,
    return
  }
}

</mosaic_0001>

<bundles_post_ra>
// kernel: net_forward.1
= control target key start
LH: loop header
LB: loop body
LE: loop exit
PB: predicated region body
PF: predicated region fallthrough
CT: control target
= control target key end

     0   :  { %9 = vsyncpa [#allocation3], 0  ;;  %s541_s0 = inlined_call_operand.hbm [shape: f32[8,32], index: 0, kind: input, shape index: {}]   ;;  %s542_s1 = inlined_call_operand.hbm [shape: f32[32,128], index: 1, kind: input, shape index: {}]   ;;  %s543_s2 = inlined_call_operand.hbm [shape: f32[128,128], index: 2, kind: input, shape index: {}]   ;;  %s544_s3 = inlined_call_operand.vmem [shape: f32[1,128], index: 3, kind: input, shape index: {}]   ;;  %s545_s4 = inlined_call_operand.hbm [shape: f32[8,128], index: 4, kind: output, shape index: {}]  }
   0x1   :  { %10 = vsyncpa [#allocation6], 0 }
   0x2   :  { %11 = vsyncpa [#allocation4], 0  ;;  %s450_s15 = smov [#allocation5]   ;;  %s356_s19 = scalar_lea.hbm %s542_s1, 512 }
   0x3   :  { %s27_s16 = sshll.u32 %s450_s15, 4  ;;  %p357_p0 = scmp.ne.s32.totalorder %s542_s1, %s356_s19  ;;  %s28_s16 = int_to_ptr.vmem [resolvable:$true] %s27_s16 }
   0x4   :  { %p360_p1 = scmp.lt.u32.totalorder %s356_s19, %s542_s1 }
   0x6   :  { %p362_p2 = pnand %p360_p1, %p357_p0 }
   0x8   :  { %365 = shalt.err (!%p362_p2)
}
   0x9   :  { %s366_s24 = scalar_lea.vmem %s28_s16, 512  ;;  %p371_p4 = scmp.lt.s32.totalorder %s28_s16, %s28_s16 }
   0xa   :  { %p367_p3 = scmp.ne.s32.totalorder %s28_s16, %s366_s24  ;;  %p372_p5 = scmp.lt.s32.totalorder %s366_s24, %s366_s24 }
   0xc   :  { %p373_p6 = por %p372_p5, %p371_p4 }
   0xe   :  { %p374_p7 = pnand %p373_p6, %p367_p3 }
  0x10   :  { %377 = shalt.err (!%p374_p7)
}
  0x11   :  { %s451_s25 = smov 128   ;;  %s452_s26 = smov 8  }
  0x12   :  { %33 = dma.hbm_to_vmem [thread:$0]  %s542_s1, 512, %s28_s16, [#allocation6], %s451_s25, %s451_s25, %s452_s26  }
  0x13   :  { %s453_s29 = smov [#allocation2]   ;;  %s454_s5 = smov [#allocation7]  }
  0x14   :  { %s18_s30 = sshll.u32 %s453_s29, 4  ;;  %s39_s6 = sshll.u32 %s454_s5, 4  ;;  %s19_s30 = int_to_ptr.vmem [resolvable:$true] %s18_s30  ;;  %s40_s6 = int_to_ptr.vmem [resolvable:$true] %s39_s6 }
  0x15   :  { %s378_s9 = scalar_lea.hbm %s541_s0, 128 }
  0x16   :  { %p379_p8 = scmp.ne.s32.totalorder %s541_s0, %s378_s9  ;;  %p382_p9 = scmp.lt.u32.totalorder %s378_s9, %s541_s0 }
  0x18   :  { %p384_p10 = pnand %p382_p9, %p379_p8 }
  0x1a   :  { %387 = shalt.err (!%p384_p10)
}
  0x1b   :  { %s388_s1 = scalar_lea.vmem %s19_s30, 128  ;;  %p393_p12 = scmp.lt.s32.totalorder %s19_s30, %s19_s30 }
  0x1c   :  { %p389_p11 = scmp.ne.s32.totalorder %s19_s30, %s388_s1  ;;  %p394_p13 = scmp.lt.s32.totalorder %s388_s1, %s388_s1 }
  0x1e   :  { %p395_p0 = por %p394_p13, %p393_p12 }
  0x20   :  { %p396_p1 = pnand %p395_p0, %p389_p11 }
  0x22   :  { %399 = shalt.err (!%p396_p1)
}
  0x23   :  { %21 = dma.hbm_to_vmem [thread:$0]  %s541_s0, 128, %s19_s30, [#allocation3]  }
  0x24   :  { %s400_s18 = scalar_lea.hbm %s543_s2, 2048 }
  0x25   :  { %p401_p2 = scmp.ne.s32.totalorder %s543_s2, %s400_s18  ;;  %p404_p3 = scmp.lt.u32.totalorder %s400_s18, %s543_s2 }
  0x27   :  { %p406_p4 = pnand %p404_p3, %p401_p2 }
  0x29   :  { %409 = shalt.err (!%p406_p4)
}
  0x2a   :  { %s410_s23 = scalar_lea.vmem %s40_s6, 2048  ;;  %p415_p6 = scmp.lt.s32.totalorder %s40_s6, %s40_s6 }
  0x2b   :  { %p411_p5 = scmp.ne.s32.totalorder %s40_s6, %s410_s23  ;;  %p416_p7 = scmp.lt.s32.totalorder %s410_s23, %s410_s23 }
  0x2d   :  { %p417_p8 = por %p416_p7, %p415_p6 }
  0x2f   :  { %p418_p9 = pnand %p417_p8, %p411_p5 }
  0x31   :  { %421 = shalt.err (!%p418_p9)
}
  0x32   :  { %45 = dma.hbm_to_vmem [thread:$0]  %s543_s2, 2048, %s40_s6, [#allocation6], %s451_s25, %s451_s25, %s452_s26  }
  0x33   :  { %444 = dma.done.wait [#allocation3], 128  }
  0x34   :  { %445 = vsyncadd [#allocation3], 4294967168 }
  0x35   :  { %446 = dma.done.wait [#allocation6], 2560  }
  0x36   :  { %447 = vsyncadd [#allocation6], 4294964736  ;;  %v455_v0 = vmov 0.0|0.0   ;;  %vm456_vm0 = vmmov 0   ;;  %v457_v1 = vmov 0.0   ;;  %v58_v2 = vld [vmem:[#allocation5] sm:$0xff] }
  0x37   :  { %317 = vmatprep.subr.bf16.mxu0 %v455_v0  ;;  %279 = vmatprep.mubr.msk.f32.mxu0 %vm456_vm0, %v457_v1  ;;  %v59_v3 = vld [vmem:[#allocation5 + $0x8] sm:$0xff]  ;;  %v60_v4 = vld [vmem:[#allocation5 + $0x10] sm:$0xff]  ;;  %v61_v6 = vld [vmem:[#allocation5 + $0x18] sm:$0xff]  ;;  %vm62_vm1 = vcmask 261120   ;;  %s458_s26 = smov [#allocation8]  }
  0x38   :  { %323 = vmatprep.subr.bf16.mxu1 %v455_v0  ;;  %314 = vmatprep.mubr.msk.f32.mxu1 %vm456_vm0, %v457_v1  ;;  %v318_v5 = vpack.c.bf16 %v59_v3, %v58_v2  ;;  %v137_v7 = vld [vmem:[#allocation7] sm:$0xff]  ;;  %v138_v8 = vld [vmem:[#allocation7 + $0x8] sm:$0xff]  ;;  %v139_v9 = vld [vmem:[#allocation7 + $0x10] sm:$0xff]  ;;  %v321_v11 = vpack.c.bf16 %v61_v6, %v60_v4  ;;  %s237_s27 = sshll.u32 %s458_s26, 4  ;;  %s238_s27 = int_to_ptr.vmem [resolvable:$true] %s237_s27 }
  0x39   :  { %v140_v10 = vld [vmem:[#allocation7 + $0x18] sm:$0xff]  ;;  %v324_v12 = vpack.c.bf16 %v138_v8, %v137_v7  ;;  %v141_v14 = vld [vmem:[#allocation7 + $0x20] sm:$0xff]  ;;  %v142_v15 = vld [vmem:[#allocation7 + $0x28] sm:$0xff]  ;;  %s422_s28 = scalar_lea.vmem %s238_s27, 128  ;;  %p427_p11 = scmp.lt.s32.totalorder %s238_s27, %s238_s27 }
  0x3a   :  { %319 = vmatpush3.bf16.msra.mxu0 %v318_v5  ;;  %v327_v13 = vpack.c.bf16 %v140_v10, %v139_v9  ;;  %v57_v16 = vld [vmem:[#allocation2] sm:$0xff]  ;;  %v330_v17 = vpack.c.bf16 %v142_v15, %v141_v14  ;;  %v143_v18 = vld [vmem:[#allocation7 + $0x30] sm:$0xff]  ;;  %v145_v21 = vld [vmem:[#allocation7 + $0x40] sm:$0xff]  ;;  %p423_p10 = scmp.ne.s32.totalorder %s238_s27, %s422_s28  ;;  %p428_p12 = scmp.lt.s32.totalorder %s422_s28, %s422_s28 }
  0x3b   :  { %320 = vmatprep.subr.bf16.mxu0 %v455_v0  ;;  %325 = vmatpush3.bf16.msra.mxu1 %v324_v12  ;;  %v144_v19 = vld [vmem:[#allocation7 + $0x38] sm:$0xff]  ;;  %v146_v22 = vld [vmem:[#allocation7 + $0x48] sm:$0xff]  ;;  %v147_v24 = vld [vmem:[#allocation7 + $0x50] sm:$0xff] }
  0x3c   :  { %326 = vmatprep.subr.bf16.mxu1 %v455_v0  ;;  %v333_v20 = vpack.c.bf16 %v144_v19, %v143_v18  ;;  %v336_v23 = vpack.c.bf16 %v146_v22, %v145_v21  ;;  %v148_v25 = vld [vmem:[#allocation7 + $0x58] sm:$0xff]  ;;  %v149_v27 = vld [vmem:[#allocation7 + $0x60] sm:$0xff]  ;;  %v150_v28 = vld [vmem:[#allocation7 + $0x68] sm:$0xff]  ;;  %p429_p13 = por %p428_p12, %p427_p11 }
  0x3d   :  { %v339_v26 = vpack.c.bf16 %v148_v25, %v147_v24  ;;  %v342_v29 = vpack.c.bf16 %v150_v28, %v149_v27  ;;  %v151_v30 = vld [vmem:[#allocation7 + $0x70] sm:$0xff]  ;;  %v152_v31 = vld [vmem:[#allocation7 + $0x78] sm:$0xff] }
  0x3e   :  { %322 = vmatpush3.bf16.msra.mxu0 %v321_v11  ;;  %v345_v32 = vpack.c.bf16 %v152_v31, %v151_v30  ;;  %v248_v36 = vld [vmem:[%s544_s3] ss:$0 sm:$0xff]  ;;  %p430_p0 = pnand %p429_p13, %p423_p10 }
  0x3f   :  { %328 = vmatpush3.bf16.msra.mxu1 %v327_v13 }
  0x40   :  { %329 = vmatprep.subr.bf16.mxu1 %v455_v0 }
  0x41   :  { %280 = vmatmul.mubr.msk.f32.vlgmr.msra.gmra.mrb[0].mxu0 %vm62_vm1, %v57_v16 }
  0x43   :  { %331 = vmatpush3.bf16.msra.mxu1 %v330_v17 }
  0x44   :  { %332 = vmatprep.subr.bf16.mxu1 %v455_v0 }
  0x47   :  { %334 = vmatpush3.bf16.msra.mxu1 %v333_v20 }
  0x48   :  { %335 = vmatprep.subr.bf16.mxu1 %v455_v0 }
  0x4b   :  { %337 = vmatpush3.bf16.msra.mxu1 %v336_v23 }
  0x4c   :  { %338 = vmatprep.subr.bf16.mxu1 %v455_v0 }
  0x4f   :  { %340 = vmatpush3.bf16.msra.mxu1 %v339_v26 }
  0x50   :  { %341 = vmatprep.subr.bf16.mxu1 %v455_v0 }
  0x53   :  { %343 = vmatpush3.bf16.msra.mxu1 %v342_v29 }
  0x54   :  { %344 = vmatprep.subr.bf16.mxu1 %v455_v0 }
  0x57   :  { %346 = vmatpush3.bf16.msra.mxu1 %v345_v32 }
 0x114   :  { %v132_v33 = vpop.f32.mrb[0].mxu0 }
 0x115   :  { %v136_v34 = vmax.f32 %v132_v33, 0.0  ;;  %v281_v35 = vpop.f32.mrb[1].mxu0 }
 0x117   :  { %315 = vmatmul.mubr.f32.vlgmr.msra.gmra.mrb[0].mxu1 %v136_v34 }
 0x1ea   :  { %v226_v37 = vpop.f32.mrb[0].mxu1 }
 0x1eb   :  { %v227_v38 = vadd.f32 %v248_v36, %v226_v37  ;;  %v316_v39 = vpop.f32.mrb[1].mxu1 }
 0x1ed   :  { %230 = vst [vmem:[#allocation8] sm:$0xff] %v227_v38 }
 0x1ee   :  { %433 = shalt.err (!%p430_p0)
}
 0x1ef   :  { %s434_s5 = scalar_lea.hbm %s545_s4, 128 }
 0x1f0   :  { %p435_p1 = scmp.ne.s32.totalorder %s545_s4, %s434_s5  ;;  %p438_p2 = scmp.lt.u32.totalorder %s434_s5, %s545_s4 }
 0x1f2   :  { %p440_p3 = pnand %p438_p2, %p435_p1 }
 0x1f4   :  { %443 = shalt.err (!%p440_p3)
}
 0x1f5   :  { %240 = dma.vmem_to_hbm [thread:$0]  %s238_s27, 128, %s545_s4, [#allocation4]  }
 0x1f6   :  { %448 = dma.done.wait [#allocation4], 128  }
 0x1f7   :  { %449 = vsyncadd [#allocation4], 4294967168 }
 0x1f8   :  { %244 = vsyncpa [#allocation3], 1 }
 0x1f9   :  { %245 = vsyncpa [#allocation6], 1 }
 0x1fa   :  { %246 = vsyncpa [#allocation4], 1 }

</bundles_post_ra>
